<compile_context>
chip_gen: v6e
topology: v6e:2x2x1
jax: 0.10.0
libtpu: 0.0.40
codegen_flags: <defaults>
</compile_context>

<pallas_src>
from typing import NamedTuple, Optional

import jax
import jax.numpy as jnp
from jax.experimental import pallas as pl
from jax.experimental.pallas import tpu as pltpu


_MAX_TILE = 512                       # per-axis tile cap (safe on v7x 64 MiB VMEM)
_PALLAS_MIN_MACS = 512 * 512 * 512    # below this, launch overhead dominates


def _round_up(x: int, m: int) -> int:
    return ((x + m - 1) // m) * m


# --------------------------------------------------------------------------- #
# Kernel
# --------------------------------------------------------------------------- #
def _fel_matmul_kernel(scale_ref, x_ref, wt_ref, o_ref):
    """One (i, j, k) grid step of  y = (x @ W_t) * scale.

    scale_ref : (1, 1) f32 in SMEM   (1/max_act, or 1.0 for plain forward)
    x_ref     : (tm, tk) activation tile
    wt_ref    : (tk, tn) pre-transposed weight tile (K, N) -> plain MXU dot,
                no in-kernel XLU transpose
    o_ref     : (tm, tn) f32 output tile, resident across the K axis; used
                directly as the accumulator (no VMEM scratch needed).
    """
    k = pl.program_id(2)

    @pl.when(k == 0)
    def _init():
        o_ref[...] = jnp.zeros_like(o_ref)

    o_ref[...] += jnp.dot(x_ref[...], wt_ref[...],
                          preferred_element_type=jnp.float32)

    @pl.when(k == pl.num_programs(2) - 1)
    def _finalize():
        o_ref[...] = o_ref[...] * scale_ref[0, 0]


# --------------------------------------------------------------------------- #
# Weight preparation (one-time, at module init / after each weight update)
# --------------------------------------------------------------------------- #
class PreparedFELWeight(NamedTuple):
    w_t: jax.Array        # (k_pad, n_pad) pre-transposed, padded, maybe bf16
    dim_act: int
    dim_ref: int
    tn: int
    tk: int


def _pick_nk_tiles(dim_ref: int, dim_act: int):
    # Single lane-dense tile when the dim fits (avoids a second mostly-padding
    # tile for mid-sized dims); otherwise 512-wide tiles for operand reuse.
    tn = _round_up(dim_act, 128) if dim_act <= _MAX_TILE else _MAX_TILE
    tk = _round_up(dim_ref, 128) if dim_ref <= _MAX_TILE else _MAX_TILE
    return tn, tk


def fel_prepare_weight(weight, *, compute_dtype: Optional[jnp.dtype] = None
                       ) -> PreparedFELWeight:
    """Transpose the PyTorch-layout (dim_act, dim_ref) weight to (K, N), pad it
    to lane-dense tile multiples and optionally cast to bf16.  Do this once at
    init / after each update so no per-forward jnp.pad / transpose is paid.
    NOTE: if the weight is updated in-place, re-run this so the pad stays zero.
    """
    dim_act, dim_ref = weight.shape
    tn, tk = _pick_nk_tiles(dim_ref, dim_act)
    n_pad = _round_up(dim_act, tn)
    k_pad = _round_up(dim_ref, tk)

    w_t = jnp.asarray(weight).T                         # (dim_ref, dim_act)
    if compute_dtype is not None:
        w_t = w_t.astype(compute_dtype)
    if w_t.shape != (k_pad, n_pad):
        w_t = jnp.pad(w_t, ((0, k_pad - dim_ref), (0, n_pad - dim_act)))
    return PreparedFELWeight(w_t=w_t, dim_act=dim_act, dim_ref=dim_ref,
                             tn=tn, tk=tk)


# --------------------------------------------------------------------------- #
# Forward / get_actions wrappers
# --------------------------------------------------------------------------- #
def fel_forward(x, weight, *, inv_scale=1.0,
                compute_dtype: Optional[jnp.dtype] = None,
                use_pallas: Optional[bool] = None):
    """Pallas equivalent of LinearFEL.forward with an optional fused scalar
    scale:  y = (x * inv_scale) @ W^T = (x @ W^T) * inv_scale.

    x:      (batch, dim_ref)
    weight: PreparedFELWeight (preferred) or raw (dim_act, dim_ref) array in
            native PyTorch nn.Linear layout (prepared on the fly — convenient
            but pays the one-time transpose/pad per call).
    """
    out_dtype = x.dtype
    batch, dim_ref = x.shape

    prepared = (weight if isinstance(weight, PreparedFELWeight)
                else fel_prepare_weight(weight, compute_dtype=compute_dtype))
    assert prepared.dim_ref == dim_ref
    dim_act = prepared.dim_act

    if use_pallas is None:
        # Controller-sized problems (a few rows x tens of features) are pure
        # launch/DMA overhead in a custom kernel; let XLA fuse scale + dot.
        use_pallas = batch * dim_ref * dim_act >= _PALLAS_MIN_MACS
    if not use_pallas:
        # f32 accumulation here too, so fallback and Pallas paths agree.
        y = jnp.dot(x.astype(prepared.w_t.dtype),
                    prepared.w_t[:dim_ref, :dim_act],
                    preferred_element_type=jnp.float32)
        y = y * jnp.asarray(inv_scale, jnp.float32)
        return y.astype(out_dtype)

    # ---- Tiled Pallas path --------------------------------------------------
    tn, tk = prepared.tn, prepared.tk
    k_pad, n_pad = prepared.w_t.shape

    tm = _round_up(batch, 8) if batch <= _MAX_TILE else _MAX_TILE
    m_pad = _round_up(batch, tm)
    # Keep >= 2 independent (i, j) tiles so both v7x TensorCores get work.
    if (m_pad // tm) * (n_pad // tn) == 1 and tm >= 256:
        tm = _round_up(tm // 2, 8)
        m_pad = _round_up(batch, tm)

    x_in = x.astype(prepared.w_t.dtype)
    if x_in.shape != (m_pad, k_pad):
        # Only the activation is padded per call (zero pad on K is exact).
        x_in = jnp.pad(x_in, ((0, m_pad - batch), (0, k_pad - dim_ref)))

    scale = jnp.reshape(jnp.asarray(inv_scale, dtype=jnp.float32), (1, 1))
    grid = (m_pad // tm, n_pad // tn, k_pad // tk)

    out = pl.pallas_call(
        _fel_matmul_kernel,
        out_shape=jax.ShapeDtypeStruct((m_pad, n_pad), jnp.float32),
        grid=grid,
        in_specs=[
            pl.BlockSpec(memory_space=pltpu.MemorySpace.SMEM),   # scale scalar
            pl.BlockSpec((tm, tk), lambda i, j, k: (i, k)),      # x tile
            pl.BlockSpec((tk, tn), lambda i, j, k: (k, j)),      # W^T tile
        ],
        out_specs=pl.BlockSpec((tm, tn), lambda i, j, k: (i, j)),
        compiler_params=pltpu.CompilerParams(
            # M/N tiles are independent -> shardable across TensorCores
            # (2 TCs on v7x); K is the reduction axis.
            dimension_semantics=("parallel", "parallel", "arbitrary"),
            # 512-wide tiles use < 8 MiB double-buffered; 48 MiB stays inside
            # v7x's 64 MiB physical VMEM with headroom (128 MiB on v5e/v6e).
            vmem_limit_bytes=48 * 1024 * 1024,
        ),
    )(scale, x_in, prepared.w_t)

    y = out[:batch, :dim_act]
    return y if y.dtype == out_dtype else y.astype(out_dtype)


def fel_get_actions(refs, weight, max_act, *,
                    compute_dtype: Optional[jnp.dtype] = None,
                    use_pallas: Optional[bool] = None):
    """Mirror of LinearFEL.get_actions: (refs / max_act) @ W^T.  For scalar
    max_act the 1/max_act normalization is folded into the kernel's output
    scale instead of a separate HBM pass over refs."""
    max_act_arr = jnp.asarray(max_act, dtype=jnp.float32)
    if max_act_arr.ndim == 0:
        return fel_forward(refs, weight, inv_scale=1.0 / max_act_arr,
                           compute_dtype=compute_dtype, use_pallas=use_pallas)
    # TODO(synk): vector-valued max_act would need a per-K-column scale folded
    # into the x tile inside the kernel; pre-divide here instead.
    return fel_forward(refs / max_act_arr.astype(refs.dtype), weight,
                       inv_scale=1.0, compute_dtype=compute_dtype,
                       use_pallas=use_pallas)


# --------------------------------------------------------------------------- #
# Demo / self-check
# --------------------------------------------------------------------------- #
if __name__ == "__main__":
    key = jax.random.PRNGKey(0)
    kx, kw, kx2, kw2 = jax.random.split(key, 4)

    # ---- Controller-sized problem, faithful to LinearFEL defaults ----------
    batch, dim_ref, dim_act = 8, 32, 16
    max_act = 2.0
    x = jax.random.normal(kx, (batch, dim_ref), dtype=jnp.float32)

    # Faithful to LinearFEL.__init__: weight is zero-initialized.
    w_zero = fel_prepare_weight(jnp.zeros((dim_act, dim_ref), jnp.float32))
    y0 = jax.block_until_ready(
        fel_get_actions(x, w_zero, max_act, use_pallas=True))
    assert y0.shape == (batch, dim_act)
    assert jnp.allclose(y0, 0.0, atol=1e-6)

    # Non-zero weight: plain forward and fused get_actions vs pure-JAX refs.
    w_raw = jax.random.normal(kw, (dim_act, dim_ref), dtype=jnp.float32) * 0.1
    w_prep = fel_prepare_weight(w_raw)       # transpose + pad once (init/update)
    y_fwd = jax.block_until_ready(fel_forward(x, w_prep, use_pallas=True))
    assert jnp.allclose(y_fwd, x @ w_raw.T, atol=1e-5, rtol=1e-5)

    y_act = jax.block_until_ready(
        fel_get_actions(x, w_prep, max_act, use_pallas=True))
    assert jnp.allclose(y_act, (x / max_act) @ w_raw.T, atol=1e-5, rtol=1e-5)

    # ---- Odd sizes: exercises M/N/K padding paths (single tile) ------------
    b1, k1, n1 = 200, 300, 160
    x1 = jax.random.normal(kx2, (b1, k1), dtype=jnp.float32)
    w1 = jax.random.normal(kw2, (n1, k1), dtype=jnp.float32) * 0.05
    y1 = jax.block_until_ready(
        fel_forward(x1, fel_prepare_weight(w1), use_pallas=True))
    assert jnp.allclose(y1, x1 @ w1.T, atol=1e-2, rtol=1e-2)

    # ---- Multi-tile grid: M split (megacore), K accumulation, K padding ----
    b2, k2, n2 = 1024, 768, 512
    x2 = jax.random.normal(kx2, (b2, k2), dtype=jnp.float32)
    w2 = jax.random.normal(kw2, (n2, k2), dtype=jnp.float32) * 0.05
    w2_prep = fel_prepare_weight(w2)
    y2 = jax.block_until_ready(fel_forward(x2, w2_prep, use_pallas=True))
    assert jnp.allclose(y2, x2 @ w2.T, atol=2e-2, rtol=2e-2)

    # ---- bf16 operands (MXU-native), f32 accumulation inside the kernel ----
    w2_bf16 = fel_prepare_weight(w2, compute_dtype=jnp.bfloat16)
    y2b = jax.block_until_ready(fel_forward(x2, w2_bf16, use_pallas=True))
    assert jnp.allclose(y2b, x2 @ w2.T, atol=5e-2, rtol=5e-2)

    print("KERNEL_OK")
</pallas_src>

<mosaic_0001>
module attributes {stable_mosaic.version = 11 : i64} {
  func.func @_fel_matmul_kernel(%arg0: i32, %arg1: i32, %arg2: i32, %arg3: memref<1x1xf32, #tpu.memory_space<smem>>, %arg4: memref<8x128xf32, #tpu.memory_space<vmem>>, %arg5: memref<128x128xf32, #tpu.memory_space<vmem>>, %arg6: memref<8x128xf32, #tpu.memory_space<vmem>>) attributes {dimension_semantics = [#tpu.dimension_semantics<parallel>, #tpu.dimension_semantics<parallel>, #tpu.dimension_semantics<arbitrary>], iteration_bounds = array<i64: 1, 1, 1>, scalar_prefetch = 0 : i64, scratch_operands = 0 : i64, tpu.core_type = #tpu.core_type<tc>, window_params = [{transform_indices = @transform_0, window_bounds = array<i64: 1, 1>}, {transform_indices = @transform_1, window_bounds = array<i64: 8, 128>}, {transform_indices = @transform_2, window_bounds = array<i64: 128, 128>}, {transform_indices = @transform_3, window_bounds = array<i64: 8, 128>}]} {
    %c0_i32 = arith.constant 0 : i32
    %0 = arith.cmpi eq, %arg2, %c0_i32 : i32
    %1 = arith.extui %0 : i1 to i32
    %c0_i32_0 = arith.constant 0 : i32
    %2 = arith.cmpi ne, %1, %c0_i32_0 : i32
    scf.if %2 {
      %cst_10 = arith.constant 0.000000e+00 : f32
      %12 = vector.broadcast %cst_10 : f32 to vector<8x128xf32>
      %c0_11 = arith.constant 0 : index
      %c0_12 = arith.constant 0 : index
      %13 = vector.load %arg6[%c0_11, %c0_12] : memref<8x128xf32, #tpu.memory_space<vmem>>, vector<8x128xf32>
      tpu.vector_store %arg6[%c0_11, %c0_12], %12 {strides = array<i32>} : memref<8x128xf32, #tpu.memory_space<vmem>>, vector<8x128xf32>,
    } else {
    }
    %c0 = arith.constant 0 : index
    %c0_1 = arith.constant 0 : index
    %3 = vector.load %arg6[%c0, %c0_1] : memref<8x128xf32, #tpu.memory_space<vmem>>, vector<8x128xf32>
    %c0_2 = arith.constant 0 : index
    %c0_3 = arith.constant 0 : index
    %4 = vector.load %arg4[%c0_2, %c0_3] : memref<8x128xf32, #tpu.memory_space<vmem>>, vector<8x128xf32>
    %c0_4 = arith.constant 0 : index
    %c0_5 = arith.constant 0 : index
    %5 = vector.load %arg5[%c0_4, %c0_5] : memref<128x128xf32, #tpu.memory_space<vmem>>, vector<128x128xf32>
    %cst = arith.constant dense<0.000000e+00> : vector<8x128xf32>
    %6 = tpu.matmul %4, %5, %cst {dimension_numbers = #tpu.dot_dimension_numbers<[1], [0], [0], [1], [0, 0, 1, 1], [], []>} : vector<8x128xf32>, vector<128x128xf32>, vector<8x128xf32> -> vector<8x128xf32>
    %7 = arith.addf %3, %6 : vector<8x128xf32>
    %c0_6 = arith.constant 0 : index
    %c0_7 = arith.constant 0 : index
    %8 = vector.load %arg6[%c0_6, %c0_7] : memref<8x128xf32, #tpu.memory_space<vmem>>, vector<8x128xf32>
    tpu.vector_store %arg6[%c0_6, %c0_7], %7 {strides = array<i32>} : memref<8x128xf32, #tpu.memory_space<vmem>>, vector<8x128xf32>,
    %c0_i32_8 = arith.constant 0 : i32
    %9 = arith.cmpi eq, %arg2, %c0_i32_8 : i32
    %10 = arith.extui %9 : i1 to i32
    %c0_i32_9 = arith.constant 0 : i32
    %11 = arith.cmpi ne, %10, %c0_i32_9 : i32
    scf.if %11 {
      %c0_10 = arith.constant 0 : index
      %c0_11 = arith.constant 0 : index
      %12 = vector.load %arg6[%c0_10, %c0_11] : memref<8x128xf32, #tpu.memory_space<vmem>>, vector<8x128xf32>
      %c0_12 = arith.constant 0 : index
      %c0_13 = arith.constant 0 : index
      %13 = memref.load %arg3[%c0_12, %c0_13] : memref<1x1xf32, #tpu.memory_space<smem>>
      %14 = vector.broadcast %13 : f32 to vector<8x128xf32>
      %15 = arith.mulf %12, %14 : vector<8x128xf32>
      %c0_14 = arith.constant 0 : index
      %c0_15 = arith.constant 0 : index
      %16 = vector.load %arg6[%c0_14, %c0_15] : memref<8x128xf32, #tpu.memory_space<vmem>>, vector<8x128xf32>
      tpu.vector_store %arg6[%c0_14, %c0_15], %15 {strides = array<i32>} : memref<8x128xf32, #tpu.memory_space<vmem>>, vector<8x128xf32>,
    } else {
    }
    return
  }
  func.func @transform_0(%arg0: i32, %arg1: i32, %arg2: i32) -> (i32, i32) {
    %c0_i32 = arith.constant 0 : i32
    %c0_i32_0 = arith.constant 0 : i32
    %c0_i32_1 = arith.constant 0 : i32
    return %c0_i32, %c0_i32_0 : i32, i32
  }
  func.func @transform_1(%arg0: i32, %arg1: i32, %arg2: i32) -> (i32, i32) {
    %c0_i32 = arith.constant 0 : i32
    return %arg0, %arg2 : i32, i32
  }
  func.func @transform_2(%arg0: i32, %arg1: i32, %arg2: i32) -> (i32, i32) {
    %c0_i32 = arith.constant 0 : i32
    return %arg2, %arg1 : i32, i32
  }
  func.func @transform_3(%arg0: i32, %arg1: i32, %arg2: i32) -> (i32, i32) {
    %c0_i32 = arith.constant 0 : i32
    return %arg0, %arg1 : i32, i32
  }
}

</mosaic_0001>

<bundles_post_ra>
// kernel: tpu_custom_call.1
= control target key start
LH: loop header
LB: loop body
LE: loop exit
PB: predicated region body
PF: predicated region fallthrough
CT: control target
= control target key end

     0   :  { %9 = vsyncpa [#allocation4], 0  ;;  %s325_s0 = inlined_call_operand.<no memory space> [shape: f32[1,1], index: 0, kind: input, shape index: {}]   ;;  %s326_s1 = inlined_call_operand.hbm [shape: f32[8,128], index: 1, kind: input, shape index: {}]   ;;  %s327_s2 = inlined_call_operand.hbm [shape: f32[128,128], index: 2, kind: input, shape index: {}]   ;;  %s328_s3 = inlined_call_operand.hbm [shape: f32[8,128], index: 3, kind: output, shape index: {}]  }
   0x1   :  { %10 = vsyncpa [#allocation7], 0 }
   0x2   :  { %11 = vsyncpa [#allocation5], 0  ;;  %s286_s12 = smov [#allocation3]   ;;  %s287_s14 = smov [#allocation6]  }
   0x3   :  { %s20_s13 = sshll.u32 %s286_s12, 4  ;;  %s29_s15 = sshll.u32 %s287_s14, 4  ;;  %s21_s13 = int_to_ptr.vmem [resolvable:$true] %s20_s13  ;;  %s30_s15 = int_to_ptr.vmem [resolvable:$true] %s29_s15 }
   0x4   :  { %s228_s16 = scalar_lea.vmem %s21_s13, 128  ;;  %p233_p1 = scmp.lt.s32.totalorder %s21_s13, %s21_s13 }
   0x5   :  { %p229_p0 = scmp.ne.s32.totalorder %s21_s13, %s228_s16  ;;  %p234_p2 = scmp.lt.s32.totalorder %s228_s16, %s228_s16 }
   0x7   :  { %p235_p3 = por %p234_p2, %p233_p1 }
   0x9   :  { %p236_p4 = pnand %p235_p3, %p229_p0 }
   0xb   :  { %239 = shalt.err (!%p236_p4)
}
   0xc   :  { %23 = dma.hbm_to_vmem [thread:$0]  %s326_s1, 128, %s21_s13, [#allocation4]  }
   0xd   :  { %s248_s19 = scalar_lea.vmem %s30_s15, 2048  ;;  %p253_p6 = scmp.lt.s32.totalorder %s30_s15, %s30_s15 }
   0xe   :  { %p249_p5 = scmp.ne.s32.totalorder %s30_s15, %s248_s19  ;;  %p254_p7 = scmp.lt.s32.totalorder %s248_s19, %s248_s19 }
  0x10   :  { %p255_p8 = por %p254_p7, %p253_p6 }
  0x12   :  { %p256_p9 = pnand %p255_p8, %p249_p5 }
  0x14   :  { %259 = shalt.err (!%p256_p9)
}
  0x15   :  { %s288_s20 = smov 128   ;;  %s289_s21 = smov 8  }
  0x16   :  { %35 = dma.hbm_to_vmem [thread:$0]  %s327_s2, 2048, %s30_s15, [#allocation7], %s288_s20, %s288_s20, %s289_s21  }
  0x17   :  { %280 = dma.done.wait [#allocation4], 128  }
  0x18   :  { %281 = vsyncadd [#allocation4], 4294967168 }
  0x19   :  { %282 = dma.done.wait [#allocation7], 2048  }
  0x1a   :  { %283 = vsyncadd [#allocation7], 4294965248  ;;  %v290_v0 = vmov 0.0   ;;  %vm291_vm0 = vmmov 0   ;;  %v64_v1 = vld [vmem:[#allocation6 + $0x78] sm:$0xff]  ;;  %v63_v2 = vld [vmem:[#allocation6 + $0x70] sm:$0xff]  ;;  %v142_v19 = vstv %s325_s0 }
  0x1b   :  { %178 = vmatprep.subr.mxu0 %v290_v0  ;;  %210 = vmatprep.mubr.msk.f32.mxu0 %vm291_vm0, %v290_v0  ;;  %v62_v3 = vld [vmem:[#allocation6 + $0x68] sm:$0xff]  ;;  %v61_v4 = vld [vmem:[#allocation6 + $0x60] sm:$0xff]  ;;  %v60_v5 = vld [vmem:[#allocation6 + $0x58] sm:$0xff]  ;;  %s292_s24 = smov [#allocation8]  }
  0x1c   :  { %179 = vmatpush3.msra.mxu0 %v64_v1  ;;  %v59_v6 = vld [vmem:[#allocation6 + $0x50] sm:$0xff]  ;;  %v58_v7 = vld [vmem:[#allocation6 + $0x48] sm:$0xff]  ;;  %v57_v8 = vld [vmem:[#allocation6 + $0x40] sm:$0xff]  ;;  %s151_s25 = sshll.u32 %s292_s24, 4  ;;  %s152_s25 = int_to_ptr.vmem [resolvable:$true] %s151_s25 }
  0x1d   :  { %180 = vmatprep.subr.mxu0 %v290_v0  ;;  %v56_v9 = vld [vmem:[#allocation6 + $0x38] sm:$0xff]  ;;  %v55_v10 = vld [vmem:[#allocation6 + $0x30] sm:$0xff]  ;;  %v54_v11 = vld [vmem:[#allocation6 + $0x28] sm:$0xff]  ;;  %s260_s26 = scalar_lea.vmem %s152_s25, 128  ;;  %p265_p11 = scmp.lt.s32.totalorder %s152_s25, %s152_s25 }
  0x1e   :  { %181 = vmatpush3.msra.mxu0 %v63_v2  ;;  %v53_v12 = vld [vmem:[#allocation6 + $0x20] sm:$0xff]  ;;  %v52_v13 = vld [vmem:[#allocation6 + $0x18] sm:$0xff]  ;;  %v51_v14 = vld [vmem:[#allocation6 + $0x10] sm:$0xff]  ;;  %p261_p10 = scmp.ne.s32.totalorder %s152_s25, %s260_s26  ;;  %p266_p12 = scmp.lt.s32.totalorder %s260_s26, %s260_s26 }
  0x1f   :  { %182 = vmatprep.subr.mxu0 %v290_v0  ;;  %v50_v15 = vld [vmem:[#allocation6 + $0x8] sm:$0xff]  ;;  %v49_v16 = vld [vmem:[#allocation6] sm:$0xff]  ;;  %v48_v17 = vld [vmem:[#allocation3] sm:$0xff] }
  0x20   :  { %183 = vmatpush3.msra.mxu0 %v62_v3  ;;  %p267_p13 = por %p266_p12, %p265_p11 }
  0x21   :  { %184 = vmatprep.subr.mxu0 %v290_v0 }
  0x22   :  { %185 = vmatpush3.msra.mxu0 %v61_v4  ;;  %p268_p0 = pnand %p267_p13, %p261_p10 }
  0x23   :  { %186 = vmatprep.subr.mxu0 %v290_v0 }
  0x24   :  { %187 = vmatpush3.msra.mxu0 %v60_v5 }
  0x25   :  { %188 = vmatprep.subr.mxu0 %v290_v0 }
  0x26   :  { %189 = vmatpush3.msra.mxu0 %v59_v6 }
  0x27   :  { %190 = vmatprep.subr.mxu0 %v290_v0 }
  0x28   :  { %191 = vmatpush3.msra.mxu0 %v58_v7 }
  0x29   :  { %192 = vmatprep.subr.mxu0 %v290_v0 }
  0x2a   :  { %193 = vmatpush3.msra.mxu0 %v57_v8 }
  0x2b   :  { %194 = vmatprep.subr.mxu0 %v290_v0 }
  0x2c   :  { %195 = vmatpush3.msra.mxu0 %v56_v9 }
  0x2d   :  { %196 = vmatprep.subr.mxu0 %v290_v0 }
  0x2e   :  { %197 = vmatpush3.msra.mxu0 %v55_v10 }
  0x2f   :  { %198 = vmatprep.subr.mxu0 %v290_v0 }
  0x30   :  { %199 = vmatpush3.msra.mxu0 %v54_v11 }
  0x31   :  { %200 = vmatprep.subr.mxu0 %v290_v0 }
  0x32   :  { %201 = vmatpush3.msra.mxu0 %v53_v12 }
  0x33   :  { %202 = vmatprep.subr.mxu0 %v290_v0 }
  0x34   :  { %203 = vmatpush3.msra.mxu0 %v52_v13 }
  0x35   :  { %204 = vmatprep.subr.mxu0 %v290_v0 }
  0x36   :  { %205 = vmatpush3.msra.mxu0 %v51_v14 }
  0x37   :  { %206 = vmatprep.subr.mxu0 %v290_v0 }
  0x38   :  { %207 = vmatpush3.msra.mxu0 %v50_v15 }
  0x39   :  { %208 = vmatprep.subr.mxu0 %v290_v0 }
  0x3a   :  { %209 = vmatpush3.msra.mxu0 %v49_v16 }
  0x3b   :  { %211 = vmatmul.mubr.f32.vlgmr.msra.gmra.mxu0 %v48_v17 }
  0xfb   :  { %v131_v18 = vpop.f32.mrf.mxu0 }
  0xfc   :  { %v143_v21 = vmul.f32 %v142_v19, %v131_v18 }
  0xfd   :  { %v212_v20 = vpop.f32.mrf.mxu0 }
  0xfe   :  { %144 = vst [vmem:[#allocation8] sm:$0xff] %v143_v21 }
  0xff   :  { %271 = shalt.err (!%p268_p0)
}
 0x100   :  { %154 = dma.vmem_to_hbm [thread:$0]  %s152_s25, 128, %s328_s3, [#allocation5]  }
 0x101   :  { %284 = dma.done.wait [#allocation5], 128  }
 0x102   :  { %285 = vsyncadd [#allocation5], 4294967168 }
 0x103   :  { %158 = vsyncpa [#allocation4], 1 }
 0x104   :  { %159 = vsyncpa [#allocation7], 1 }
 0x105   :  { %160 = vsyncpa [#allocation5], 1 }

</bundles_post_ra>
